<compile_context>
chip_gen: v7x
topology: tpu7x:2x2x1
jax: 0.10.0
libtpu: 0.0.40
codegen_flags: <defaults>
</compile_context>

<pallas_src>
import functools
import math

import jax
import jax.numpy as jnp
from jax.experimental import pallas as pl
from jax.experimental.pallas import tpu as pltpu


# ----------------------------------------------------------------------------
# Pooling geometry (identical math to SpatialPyramidPooling2d.forward).
# ----------------------------------------------------------------------------
def _level_params(W, level):
    k = math.ceil(W / level)
    s = k
    p = math.floor((k * level - W + 1) / 2)
    out_w = (W + 2 * p - k) // s + 1  # F.max_pool2d / F.avg_pool2d, ceil_mode=False
    return k, s, p, out_w


def _windows(W, num_level):
    """Per level: tuple of (lo, hi) clipped window bounds along W (static ints)."""
    wins_per_level, kernels, out_ws = [], [], []
    for i in range(num_level):
        k, s, p, out_w = _level_params(W, i + 1)
        if p > k / 2:
            # PyTorch's own pooling check would reject this configuration.
            raise ValueError(
                f"level {i + 1}: pad {p} > kernel {k}/2 (PyTorch would raise)")
        wins = []
        for j in range(out_w):
            start = j * s - p
            lo, hi = max(start, 0), min(start + k, W)
            assert hi > lo, "pooling window entirely inside padding"
            wins.append((lo, hi))
        wins_per_level.append(tuple(wins))
        kernels.append(k)
        out_ws.append(out_w)
    return tuple(wins_per_level), tuple(kernels), tuple(out_ws)


def _cdiv(a, b):
    return -(-a // b)


def _ceil_to(a, b):
    return _cdiv(a, b) * b


# ----------------------------------------------------------------------------
# Chip-generation helpers (tiling / dtype decisions only).
# ----------------------------------------------------------------------------
def _device_kind():
    try:
        return jax.devices()[0].device_kind.lower()
    except Exception:  # pragma: no cover - defensive
        return ""


def _num_tensorcores(kind):
    # v7x exposes 2 TensorCores per device; v4/v5p megacore chips also do.
    # v5e / v6e are single-TensorCore: never force a grid split there.
    return 2 if any(tag in kind for tag in ("v7", "v4", "v5p")) else 1


def _has_native_bf16_vpu(kind):
    # v6e / v7x VALUs execute bf16 natively; v5e and older do not.
    return any(tag in kind for tag in ("v6", "v7"))


# ----------------------------------------------------------------------------
# Kernel
# ----------------------------------------------------------------------------
_LANE_CHUNK = 128  # one vreg of lanes: the W live row vectors + temporaries
                   # stay comfortably inside the 64-vreg register file.


def _tree_reduce(fn, vals):
    """Balanced pairwise reduction (short dependency chains on the VALU)."""
    vals = list(vals)
    while len(vals) > 1:
        nxt = [fn(vals[i], vals[i + 1]) for i in range(0, len(vals) - 1, 2)]
        if len(vals) % 2:
            nxt.append(vals[-1])
        vals = nxt
    return vals[0]


def _spp_pool_kernel(x_ref, o_ref, *, windows, kernels, pool_type, compute_dtype):
    """x_ref: (W, R_TILE) lane-dense input tile; o_ref: (total, R_TILE) merged output.

    All window reductions are elementwise jnp.maximum / jnp.add chains over
    single-row reads (VALU slots), never cross-sublane reductions of misaligned
    ref slices (XLU).  The merged output block is written back to HBM with a
    single DMA per grid step regardless of how many VMEM row stores occur here.
    PyTorch semantics: max_pool pads with -inf (== max over the clipped valid
    window); avg_pool uses count_include_pad=True (== sum over valid / k).
    """
    W = x_ref.shape[0]
    r_tile = x_ref.shape[1]
    is_max = pool_type == "max_pool"
    for c in range(r_tile // _LANE_CHUNK):
        sl = slice(c * _LANE_CHUNK, (c + 1) * _LANE_CHUNK)
        # Read each of the W input rows of this lane chunk once; they are
        # reused by every window of every pyramid level below.
        rows = [x_ref[w:w + 1, sl].astype(compute_dtype) for w in range(W)]
        j = 0
        for wins, k in zip(windows, kernels):
            scale = 1.0 / float(k)  # count_include_pad=True divisor
            for lo, hi in wins:
                red = _tree_reduce(jnp.maximum if is_max else jnp.add,
                                   rows[lo:hi])
                if not is_max:
                    red = red * scale
                o_ref[j:j + 1, sl] = red.astype(o_ref.dtype)
                j += 1


# ----------------------------------------------------------------------------
# Wrapper == SPPNet(num_level, pool_type).forward(x)
# ----------------------------------------------------------------------------
def spp_forward(x, num_level, pool_type="max_pool", *, lane_tile=4096):
    N, C, H, W = x.shape
    R = N * C * H
    windows, kernels, out_ws = _windows(W, num_level)
    total = sum(out_ws)

    kind = _device_kind()

    # --- lane tiling: pad R only to the 128-lane vreg width; take the biggest
    # tile by default, and split only on chips that actually have >1 TC. ------
    R_pad = _ceil_to(R, 128)
    r_tile = min(max(128, (lane_tile // 128) * 128), R_pad)
    n_cores = _num_tensorcores(kind)
    if n_cores > 1:
        # Aim for >= 4 blocks per TensorCore so the "parallel" grid axis both
        # load-balances across cores and leaves room for DMA double-buffering.
        target_blocks = 4 * n_cores
        if R_pad >= target_blocks * 128:
            r_tile = min(r_tile, _ceil_to(_cdiv(R_pad, target_blocks), 128))
    num_blocks = _cdiv(R_pad, r_tile)  # ragged last block is masked by Pallas

    # The ONE remaining wrapper-side pass: transpose (R, W) -> (W, R) so R is
    # lane-dense in the kernel.  Skip the pad copy when R is already aligned.
    xt = jnp.transpose(x.reshape(R, W))                    # (W, R)
    if R_pad != R:
        xt = jnp.pad(xt, ((0, 0), (0, R_pad - R)))

    if pool_type == "max_pool":
        # bf16/f16 max stays low-precision on bf16-capable VPUs (v6e/v7x);
        # older chips (v5e and earlier) upcast to f32 for the elementwise max.
        compute_dtype = (x.dtype if (_has_native_bf16_vpu(kind)
                                     or x.dtype == jnp.float32)
                         else jnp.float32)
    else:
        compute_dtype = jnp.float32  # exact f32 window sums (keeps 1e-5 tol)

    kernel = functools.partial(
        _spp_pool_kernel, windows=windows, kernels=kernels,
        pool_type=pool_type, compute_dtype=compute_dtype)

    out = pl.pallas_call(
        kernel,
        out_shape=jax.ShapeDtypeStruct((total, R_pad), x.dtype),
        grid=(num_blocks,),
        in_specs=[pl.BlockSpec((W, r_tile), lambda r: (0, r))],
        out_specs=pl.BlockSpec((total, r_tile), lambda r: (0, r)),
        compiler_params=pltpu.CompilerParams(
            dimension_semantics=("parallel",)),
    )(xt)

    # Single post-kernel transpose, then per-level reshapes/concat reproduce
    # PyTorch's `cat([pool_l(x).view(N, -1) for l in levels], dim=1)` ordering.
    y = out[:, :R] if R_pad != R else out
    y = jnp.transpose(y).reshape(N, C * H, total)          # (N, C*H, total)
    pieces, off = [], 0
    for ow in out_ws:
        pieces.append(y[:, :, off:off + ow].reshape(N, C * H * ow))
        off += ow
    return jnp.concatenate(pieces, axis=1)


# ----------------------------------------------------------------------------
# Pure-JAX reference (same PyTorch pooling semantics), for validation only.
# ----------------------------------------------------------------------------
def _spp_reference(x, num_level, pool_type="max_pool"):
    N, C, H, W = x.shape
    pieces = []
    for i in range(num_level):
        level = i + 1
        k, s, p, out_w = _level_params(W, level)
        cols = []
        for j in range(out_w):
            start = j * s - p
            lo, hi = max(start, 0), min(start + k, W)
            win = x[:, :, :, lo:hi]
            if pool_type == "max_pool":
                cols.append(jnp.max(win, axis=-1, keepdims=True))
            else:
                cols.append(jnp.sum(win, axis=-1, keepdims=True) / float(k))
        lvl = jnp.concatenate(cols, axis=-1)  # (N, C, H, out_w)
        pieces.append(lvl.reshape(N, -1))
    return jnp.concatenate(pieces, axis=1)


if __name__ == "__main__":
    key = jax.random.PRNGKey(0)
    N, C, H, W = 2, 4, 16, 16
    # SPPNet's default num_level=50 is infeasible for W=16 under PyTorch's own
    # "pad <= kernel_size/2" pooling constraint; use a valid small level count.
    # TODO(synk): num_level=50 with W=16 would raise inside PyTorch itself.
    num_level = 6

    x = jax.random.normal(key, (N, C, H, W), dtype=jnp.float32)
    expected_feats = C * H * sum(_level_params(W, i + 1)[3] for i in range(num_level))

    # max_pool path (SPPNet default).
    y_max = spp_forward(x, num_level=num_level, pool_type="max_pool")
    jax.block_until_ready(y_max)
    assert y_max.shape == (N, expected_feats), y_max.shape
    y_max_ref = _spp_reference(x, num_level, "max_pool")
    assert jnp.allclose(y_max, y_max_ref, atol=1e-6, rtol=1e-6)

    # avg_pool path (exact f32 VPU window sums).
    y_avg = spp_forward(x, num_level=num_level, pool_type="avg_pool")
    jax.block_until_ready(y_avg)
    assert y_avg.shape == (N, expected_feats), y_avg.shape
    y_avg_ref = _spp_reference(x, num_level, "avg_pool")
    assert jnp.allclose(y_avg, y_avg_ref, atol=1e-5, rtol=1e-5)

    # Ragged case (R = 30, not a multiple of 128) exercises the pad/slice path.
    x2 = jax.random.normal(jax.random.PRNGKey(1), (1, 3, 10, 16), dtype=jnp.float32)
    y2 = spp_forward(x2, num_level=4, pool_type="max_pool")
    jax.block_until_ready(y2)
    assert jnp.allclose(y2, _spp_reference(x2, 4, "max_pool"), atol=1e-6, rtol=1e-6)

    print("KERNEL_OK")
</pallas_src>

<mosaic_0001>
module attributes {stable_mosaic.version = 11 : i64} {
  func.func @_spp_pool_kernel(%arg0: i32, %arg1: memref<16x128xf32, #tpu.memory_space<vmem>>, %arg2: memref<21x128xf32, #tpu.memory_space<vmem>>) attributes {dimension_semantics = [#tpu.dimension_semantics<parallel>], iteration_bounds = array<i64: 1>, scalar_prefetch = 0 : i64, scratch_operands = 0 : i64, tpu.core_type = #tpu.core_type<tc>, window_params = [{transform_indices = @transform_0, window_bounds = array<i64: 16, 128>}, {transform_indices = @transform_1, window_bounds = array<i64: 21, 128>}]} {
    %c0 = arith.constant 0 : index
    %c0_0 = arith.constant 0 : index
    %0 = vector.load %arg1[%c0, %c0_0] : memref<16x128xf32, #tpu.memory_space<vmem>>, vector<1x128xf32>
    %c1 = arith.constant 1 : index
    %c0_1 = arith.constant 0 : index
    %1 = vector.load %arg1[%c1, %c0_1] : memref<16x128xf32, #tpu.memory_space<vmem>>, vector<1x128xf32>
    %c2 = arith.constant 2 : index
    %c0_2 = arith.constant 0 : index
    %2 = vector.load %arg1[%c2, %c0_2] : memref<16x128xf32, #tpu.memory_space<vmem>>, vector<1x128xf32>
    %c3 = arith.constant 3 : index
    %c0_3 = arith.constant 0 : index
    %3 = vector.load %arg1[%c3, %c0_3] : memref<16x128xf32, #tpu.memory_space<vmem>>, vector<1x128xf32>
    %c4 = arith.constant 4 : index
    %c0_4 = arith.constant 0 : index
    %4 = vector.load %arg1[%c4, %c0_4] : memref<16x128xf32, #tpu.memory_space<vmem>>, vector<1x128xf32>
    %c5 = arith.constant 5 : index
    %c0_5 = arith.constant 0 : index
    %5 = vector.load %arg1[%c5, %c0_5] : memref<16x128xf32, #tpu.memory_space<vmem>>, vector<1x128xf32>
    %c6 = arith.constant 6 : index
    %c0_6 = arith.constant 0 : index
    %6 = vector.load %arg1[%c6, %c0_6] : memref<16x128xf32, #tpu.memory_space<vmem>>, vector<1x128xf32>
    %c7 = arith.constant 7 : index
    %c0_7 = arith.constant 0 : index
    %7 = vector.load %arg1[%c7, %c0_7] : memref<16x128xf32, #tpu.memory_space<vmem>>, vector<1x128xf32>
    %c8 = arith.constant 8 : index
    %c0_8 = arith.constant 0 : index
    %8 = vector.load %arg1[%c8, %c0_8] : memref<16x128xf32, #tpu.memory_space<vmem>>, vector<1x128xf32>
    %c9 = arith.constant 9 : index
    %c0_9 = arith.constant 0 : index
    %9 = vector.load %arg1[%c9, %c0_9] : memref<16x128xf32, #tpu.memory_space<vmem>>, vector<1x128xf32>
    %c10 = arith.constant 10 : index
    %c0_10 = arith.constant 0 : index
    %10 = vector.load %arg1[%c10, %c0_10] : memref<16x128xf32, #tpu.memory_space<vmem>>, vector<1x128xf32>
    %c11 = arith.constant 11 : index
    %c0_11 = arith.constant 0 : index
    %11 = vector.load %arg1[%c11, %c0_11] : memref<16x128xf32, #tpu.memory_space<vmem>>, vector<1x128xf32>
    %c12 = arith.constant 12 : index
    %c0_12 = arith.constant 0 : index
    %12 = vector.load %arg1[%c12, %c0_12] : memref<16x128xf32, #tpu.memory_space<vmem>>, vector<1x128xf32>
    %c13 = arith.constant 13 : index
    %c0_13 = arith.constant 0 : index
    %13 = vector.load %arg1[%c13, %c0_13] : memref<16x128xf32, #tpu.memory_space<vmem>>, vector<1x128xf32>
    %c14 = arith.constant 14 : index
    %c0_14 = arith.constant 0 : index
    %14 = vector.load %arg1[%c14, %c0_14] : memref<16x128xf32, #tpu.memory_space<vmem>>, vector<1x128xf32>
    %c15 = arith.constant 15 : index
    %c0_15 = arith.constant 0 : index
    %15 = vector.load %arg1[%c15, %c0_15] : memref<16x128xf32, #tpu.memory_space<vmem>>, vector<1x128xf32>
    %16 = arith.maximumf %0, %1 : vector<1x128xf32>
    %17 = arith.maximumf %2, %3 : vector<1x128xf32>
    %18 = arith.maximumf %4, %5 : vector<1x128xf32>
    %19 = arith.maximumf %6, %7 : vector<1x128xf32>
    %20 = arith.maximumf %8, %9 : vector<1x128xf32>
    %21 = arith.maximumf %10, %11 : vector<1x128xf32>
    %22 = arith.maximumf %12, %13 : vector<1x128xf32>
    %23 = arith.maximumf %14, %15 : vector<1x128xf32>
    %24 = arith.maximumf %16, %17 : vector<1x128xf32>
    %25 = arith.maximumf %18, %19 : vector<1x128xf32>
    %26 = arith.maximumf %20, %21 : vector<1x128xf32>
    %27 = arith.maximumf %22, %23 : vector<1x128xf32>
    %28 = arith.maximumf %24, %25 : vector<1x128xf32>
    %29 = arith.maximumf %26, %27 : vector<1x128xf32>
    %30 = arith.maximumf %28, %29 : vector<1x128xf32>
    %c0_16 = arith.constant 0 : index
    %c0_17 = arith.constant 0 : index
    %31 = vector.load %arg2[%c0_16, %c0_17] : memref<21x128xf32, #tpu.memory_space<vmem>>, vector<1x128xf32>
    tpu.vector_store %arg2[%c0_16, %c0_17], %30 {strides = array<i32>} : memref<21x128xf32, #tpu.memory_space<vmem>>, vector<1x128xf32>,
    %32 = arith.maximumf %0, %1 : vector<1x128xf32>
    %33 = arith.maximumf %2, %3 : vector<1x128xf32>
    %34 = arith.maximumf %4, %5 : vector<1x128xf32>
    %35 = arith.maximumf %6, %7 : vector<1x128xf32>
    %36 = arith.maximumf %32, %33 : vector<1x128xf32>
    %37 = arith.maximumf %34, %35 : vector<1x128xf32>
    %38 = arith.maximumf %36, %37 : vector<1x128xf32>
    %c1_18 = arith.constant 1 : index
    %c0_19 = arith.constant 0 : index
    %39 = vector.load %arg2[%c1_18, %c0_19] : memref<21x128xf32, #tpu.memory_space<vmem>>, vector<1x128xf32>
    tpu.vector_store %arg2[%c1_18, %c0_19], %38 {strides = array<i32>} : memref<21x128xf32, #tpu.memory_space<vmem>>, vector<1x128xf32>,
    %40 = arith.maximumf %8, %9 : vector<1x128xf32>
    %41 = arith.maximumf %10, %11 : vector<1x128xf32>
    %42 = arith.maximumf %12, %13 : vector<1x128xf32>
    %43 = arith.maximumf %14, %15 : vector<1x128xf32>
    %44 = arith.maximumf %40, %41 : vector<1x128xf32>
    %45 = arith.maximumf %42, %43 : vector<1x128xf32>
    %46 = arith.maximumf %44, %45 : vector<1x128xf32>
    %c2_20 = arith.constant 2 : index
    %c0_21 = arith.constant 0 : index
    %47 = vector.load %arg2[%c2_20, %c0_21] : memref<21x128xf32, #tpu.memory_space<vmem>>, vector<1x128xf32>
    tpu.vector_store %arg2[%c2_20, %c0_21], %46 {strides = array<i32>} : memref<21x128xf32, #tpu.memory_space<vmem>>, vector<1x128xf32>,
    %48 = arith.maximumf %0, %1 : vector<1x128xf32>
    %49 = arith.maximumf %2, %3 : vector<1x128xf32>
    %50 = arith.maximumf %48, %49 : vector<1x128xf32>
    %51 = arith.maximumf %50, %4 : vector<1x128xf32>
    %c3_22 = arith.constant 3 : index
    %c0_23 = arith.constant 0 : index
    %52 = vector.load %arg2[%c3_22, %c0_23] : memref<21x128xf32, #tpu.memory_space<vmem>>, vector<1x128xf32>
    tpu.vector_store %arg2[%c3_22, %c0_23], %51 {strides = array<i32>} : memref<21x128xf32, #tpu.memory_space<vmem>>, vector<1x128xf32>,
    %53 = arith.maximumf %5, %6 : vector<1x128xf32>
    %54 = arith.maximumf %7, %8 : vector<1x128xf32>
    %55 = arith.maximumf %9, %10 : vector<1x128xf32>
    %56 = arith.maximumf %53, %54 : vector<1x128xf32>
    %57 = arith.maximumf %56, %55 : vector<1x128xf32>
    %c4_24 = arith.constant 4 : index
    %c0_25 = arith.constant 0 : index
    %58 = vector.load %arg2[%c4_24, %c0_25] : memref<21x128xf32, #tpu.memory_space<vmem>>, vector<1x128xf32>
    tpu.vector_store %arg2[%c4_24, %c0_25], %57 {strides = array<i32>} : memref<21x128xf32, #tpu.memory_space<vmem>>, vector<1x128xf32>,
    %59 = arith.maximumf %11, %12 : vector<1x128xf32>
    %60 = arith.maximumf %13, %14 : vector<1x128xf32>
    %61 = arith.maximumf %59, %60 : vector<1x128xf32>
    %62 = arith.maximumf %61, %15 : vector<1x128xf32>
    %c5_26 = arith.constant 5 : index
    %c0_27 = arith.constant 0 : index
    %63 = vector.load %arg2[%c5_26, %c0_27] : memref<21x128xf32, #tpu.memory_space<vmem>>, vector<1x128xf32>
    tpu.vector_store %arg2[%c5_26, %c0_27], %62 {strides = array<i32>} : memref<21x128xf32, #tpu.memory_space<vmem>>, vector<1x128xf32>,
    %64 = arith.maximumf %0, %1 : vector<1x128xf32>
    %65 = arith.maximumf %2, %3 : vector<1x128xf32>
    %66 = arith.maximumf %64, %65 : vector<1x128xf32>
    %c6_28 = arith.constant 6 : index
    %c0_29 = arith.constant 0 : index
    %67 = vector.load %arg2[%c6_28, %c0_29] : memref<21x128xf32, #tpu.memory_space<vmem>>, vector<1x128xf32>
    tpu.vector_store %arg2[%c6_28, %c0_29], %66 {strides = array<i32>} : memref<21x128xf32, #tpu.memory_space<vmem>>, vector<1x128xf32>,
    %68 = arith.maximumf %4, %5 : vector<1x128xf32>
    %69 = arith.maximumf %6, %7 : vector<1x128xf32>
    %70 = arith.maximumf %68, %69 : vector<1x128xf32>
    %c7_30 = arith.constant 7 : index
    %c0_31 = arith.constant 0 : index
    %71 = vector.load %arg2[%c7_30, %c0_31] : memref<21x128xf32, #tpu.memory_space<vmem>>, vector<1x128xf32>
    tpu.vector_store %arg2[%c7_30, %c0_31], %70 {strides = array<i32>} : memref<21x128xf32, #tpu.memory_space<vmem>>, vector<1x128xf32>,
    %72 = arith.maximumf %8, %9 : vector<1x128xf32>
    %73 = arith.maximumf %10, %11 : vector<1x128xf32>
    %74 = arith.maximumf %72, %73 : vector<1x128xf32>
    %c8_32 = arith.constant 8 : index
    %c0_33 = arith.constant 0 : index
    %75 = vector.load %arg2[%c8_32, %c0_33] : memref<21x128xf32, #tpu.memory_space<vmem>>, vector<1x128xf32>
    tpu.vector_store %arg2[%c8_32, %c0_33], %74 {strides = array<i32>} : memref<21x128xf32, #tpu.memory_space<vmem>>, vector<1x128xf32>,
    %76 = arith.maximumf %12, %13 : vector<1x128xf32>
    %77 = arith.maximumf %14, %15 : vector<1x128xf32>
    %78 = arith.maximumf %76, %77 : vector<1x128xf32>
    %c9_34 = arith.constant 9 : index
    %c0_35 = arith.constant 0 : index
    %79 = vector.load %arg2[%c9_34, %c0_35] : memref<21x128xf32, #tpu.memory_space<vmem>>, vector<1x128xf32>
    tpu.vector_store %arg2[%c9_34, %c0_35], %78 {strides = array<i32>} : memref<21x128xf32, #tpu.memory_space<vmem>>, vector<1x128xf32>,
    %80 = arith.maximumf %0, %1 : vector<1x128xf32>
    %c10_36 = arith.constant 10 : index
    %c0_37 = arith.constant 0 : index
    %81 = vector.load %arg2[%c10_36, %c0_37] : memref<21x128xf32, #tpu.memory_space<vmem>>, vector<1x128xf32>
    tpu.vector_store %arg2[%c10_36, %c0_37], %80 {strides = array<i32>} : memref<21x128xf32, #tpu.memory_space<vmem>>, vector<1x128xf32>,
    %82 = arith.maximumf %2, %3 : vector<1x128xf32>
    %83 = arith.maximumf %4, %5 : vector<1x128xf32>
    %84 = arith.maximumf %82, %83 : vector<1x128xf32>
    %c11_38 = arith.constant 11 : index
    %c0_39 = arith.constant 0 : index
    %85 = vector.load %arg2[%c11_38, %c0_39] : memref<21x128xf32, #tpu.memory_space<vmem>>, vector<1x128xf32>
    tpu.vector_store %arg2[%c11_38, %c0_39], %84 {strides = array<i32>} : memref<21x128xf32, #tpu.memory_space<vmem>>, vector<1x128xf32>,
    %86 = arith.maximumf %6, %7 : vector<1x128xf32>
    %87 = arith.maximumf %8, %9 : vector<1x128xf32>
    %88 = arith.maximumf %86, %87 : vector<1x128xf32>
    %c12_40 = arith.constant 12 : index
    %c0_41 = arith.constant 0 : index
    %89 = vector.load %arg2[%c12_40, %c0_41] : memref<21x128xf32, #tpu.memory_space<vmem>>, vector<1x128xf32>
    tpu.vector_store %arg2[%c12_40, %c0_41], %88 {strides = array<i32>} : memref<21x128xf32, #tpu.memory_space<vmem>>, vector<1x128xf32>,
    %90 = arith.maximumf %10, %11 : vector<1x128xf32>
    %91 = arith.maximumf %12, %13 : vector<1x128xf32>
    %92 = arith.maximumf %90, %91 : vector<1x128xf32>
    %c13_42 = arith.constant 13 : index
    %c0_43 = arith.constant 0 : index
    %93 = vector.load %arg2[%c13_42, %c0_43] : memref<21x128xf32, #tpu.memory_space<vmem>>, vector<1x128xf32>
    tpu.vector_store %arg2[%c13_42, %c0_43], %92 {strides = array<i32>} : memref<21x128xf32, #tpu.memory_space<vmem>>, vector<1x128xf32>,
    %94 = arith.maximumf %14, %15 : vector<1x128xf32>
    %c14_44 = arith.constant 14 : index
    %c0_45 = arith.constant 0 : index
    %95 = vector.load %arg2[%c14_44, %c0_45] : memref<21x128xf32, #tpu.memory_space<vmem>>, vector<1x128xf32>
    tpu.vector_store %arg2[%c14_44, %c0_45], %94 {strides = array<i32>} : memref<21x128xf32, #tpu.memory_space<vmem>>, vector<1x128xf32>,
    %96 = arith.maximumf %0, %1 : vector<1x128xf32>
    %c15_46 = arith.constant 15 : index
    %c0_47 = arith.constant 0 : index
    %97 = vector.load %arg2[%c15_46, %c0_47] : memref<21x128xf32, #tpu.memory_space<vmem>>, vector<1x128xf32>
    tpu.vector_store %arg2[%c15_46, %c0_47], %96 {strides = array<i32>} : memref<21x128xf32, #tpu.memory_space<vmem>>, vector<1x128xf32>,
    %98 = arith.maximumf %2, %3 : vector<1x128xf32>
    %99 = arith.maximumf %98, %4 : vector<1x128xf32>
    %c16 = arith.constant 16 : index
    %c0_48 = arith.constant 0 : index
    %100 = vector.load %arg2[%c16, %c0_48] : memref<21x128xf32, #tpu.memory_space<vmem>>, vector<1x128xf32>
    tpu.vector_store %arg2[%c16, %c0_48], %99 {strides = array<i32>} : memref<21x128xf32, #tpu.memory_space<vmem>>, vector<1x128xf32>,
    %101 = arith.maximumf %5, %6 : vector<1x128xf32>
    %102 = arith.maximumf %101, %7 : vector<1x128xf32>
    %c17 = arith.constant 17 : index
    %c0_49 = arith.constant 0 : index
    %103 = vector.load %arg2[%c17, %c0_49] : memref<21x128xf32, #tpu.memory_space<vmem>>, vector<1x128xf32>
    tpu.vector_store %arg2[%c17, %c0_49], %102 {strides = array<i32>} : memref<21x128xf32, #tpu.memory_space<vmem>>, vector<1x128xf32>,
    %104 = arith.maximumf %8, %9 : vector<1x128xf32>
    %105 = arith.maximumf %104, %10 : vector<1x128xf32>
    %c18 = arith.constant 18 : index
    %c0_50 = arith.constant 0 : index
    %106 = vector.load %arg2[%c18, %c0_50] : memref<21x128xf32, #tpu.memory_space<vmem>>, vector<1x128xf32>
    tpu.vector_store %arg2[%c18, %c0_50], %105 {strides = array<i32>} : memref<21x128xf32, #tpu.memory_space<vmem>>, vector<1x128xf32>,
    %107 = arith.maximumf %11, %12 : vector<1x128xf32>
    %108 = arith.maximumf %107, %13 : vector<1x128xf32>
    %c19 = arith.constant 19 : index
    %c0_51 = arith.constant 0 : index
    %109 = vector.load %arg2[%c19, %c0_51] : memref<21x128xf32, #tpu.memory_space<vmem>>, vector<1x128xf32>
    tpu.vector_store %arg2[%c19, %c0_51], %108 {strides = array<i32>} : memref<21x128xf32, #tpu.memory_space<vmem>>, vector<1x128xf32>,
    %110 = arith.maximumf %14, %15 : vector<1x128xf32>
    %c20 = arith.constant 20 : index
    %c0_52 = arith.constant 0 : index
    %111 = vector.load %arg2[%c20, %c0_52] : memref<21x128xf32, #tpu.memory_space<vmem>>, vector<1x128xf32>
    tpu.vector_store %arg2[%c20, %c0_52], %110 {strides = array<i32>} : memref<21x128xf32, #tpu.memory_space<vmem>>, vector<1x128xf32>,
    return
  }
  func.func @transform_0(%arg0: i32) -> (i32, i32) {
    %c0_i32 = arith.constant 0 : i32
    %c0_i32_0 = arith.constant 0 : i32
    return %c0_i32, %arg0 : i32, i32
  }
  func.func @transform_1(%arg0: i32) -> (i32, i32) {
    %c0_i32 = arith.constant 0 : i32
    %c0_i32_0 = arith.constant 0 : i32
    return %c0_i32, %arg0 : i32, i32
  }
}

</mosaic_0001>

<bundles_post_ra>
// kernel: tpu_custom_call.1
= control target key start
LH: loop header
LB: loop body
LE: loop exit
PB: predicated region body
PF: predicated region fallthrough
CT: control target
= control target key end

     0   :  { %6 = vsyncpa [#allocation3], 0  ;;  %s205_s0 = inlined_call_operand.hbm [shape: f32[16,128], index: 0, kind: input, shape index: {}]   ;;  %s206_s1 = inlined_call_operand.hbm [shape: f32[21,128], index: 1, kind: output, shape index: {}]  }
   0x1   :  { %7 = vsyncpa [#allocation4], 0  ;;  %s161_s6 = smov [#allocation2]   ;;  %s113_s10 = scalar_lea.hbm %s205_s0, 256 }
   0x2   :  { %s13_s7 = sshll.u32 %s161_s6, 4  ;;  %p114_p0 = scmp.ne.s32.totalorder %s205_s0, %s113_s10  ;;  %s14_s7 = int_to_ptr.vmem [resolvable:$true] %s13_s7 }
   0x3   :  { %p117_p1 = scmp.lt.u32.totalorder %s113_s10, %s205_s0 }
   0x5   :  { %p119_p2 = pnand %p117_p1, %p114_p0 }
   0x7   :  { %122 = shalt.err (!%p119_p2)
}
   0x8   :  { %s123_s15 = scalar_lea.vmem %s14_s7, 256  ;;  %p128_p4 = scmp.lt.s32.totalorder %s14_s7, %s14_s7 }
   0x9   :  { %p124_p3 = scmp.ne.s32.totalorder %s14_s7, %s123_s15  ;;  %p129_p5 = scmp.lt.s32.totalorder %s123_s15, %s123_s15 }
   0xb   :  { %p130_p6 = por %p129_p5, %p128_p4 }
   0xd   :  { %p131_p7 = pnand %p130_p6, %p124_p3 }
   0xf   :  { %134 = shalt.err (!%p131_p7)
}
  0x10   :  { %s162_s16 = smov 128   ;;  %s163_s17 = smov 8  }
  0x11   :  { %19 = dma.hbm_to_vmem [thread:$0]  %s205_s0, 256, %s14_s7, [#allocation3], %s162_s16, %s162_s16, %s163_s17  }
  0x12   :  { %157 = dma.done.wait [#allocation3], 256  }
  0x13   :  { %158 = vsyncadd [#allocation3], 4294967040  ;;  %v23_v0 = vld [vmem:[#allocation2] sm:$0x1]  ;;  %v24_v1 = vld [vmem:[#allocation2 + $0x1] sm:$0x1] }
  0x14   :  { %v25_v2 = vld [vmem:[#allocation2 + $0x2] sm:$0x1]  ;;  %v26_v3 = vld [vmem:[#allocation2 + $0x3] sm:$0x1]  ;;  %v27_v4 = vld [vmem:[#allocation2 + $0x4] sm:$0x1]  ;;  %v39_v6 = vmax.f32 %v23_v0, %v24_v1 }
  0x15   :  { %v28_v5 = vld [vmem:[#allocation2 + $0x5] sm:$0x1]  ;;  %v29_v7 = vld [vmem:[#allocation2 + $0x6] sm:$0x1]  ;;  %v30_v8 = vld [vmem:[#allocation2 + $0x7] sm:$0x1]  ;;  %v40_v10 = vmax.f32 %v25_v2, %v26_v3 }
  0x16   :  { %v31_v9 = vld [vmem:[#allocation2 + $0x8] sm:$0x1]  ;;  %v41_v11 = vmax.f32 %v27_v4, %v28_v5  ;;  %v32_v12 = vld [vmem:[#allocation2 + $0x9] sm:$0x1]  ;;  %v33_v13 = vld [vmem:[#allocation2 + $0xa] sm:$0x1]  ;;  %v42_v15 = vmax.f32 %v29_v7, %v30_v8  ;;  %v59_v16 = vmax.f32 %v28_v5, %v29_v7 }
  0x17   :  { %v34_v14 = vld [vmem:[#allocation2 + $0xb] sm:$0x1]  ;;  %74 = vst [vmem:[#allocation5 + $0xa] sm:$0x1] %v39_v6  ;;  %82 = vst [vmem:[#allocation5 + $0xf] sm:$0x1] %v39_v6  ;;  %v60_v17 = vmax.f32 %v30_v8, %v31_v9  ;;  %v43_v21 = vmax.f32 %v31_v9, %v32_v12  ;;  %v47_v23 = vmax.f32 %v39_v6, %v40_v10 }
  0x18   :  { %v35_v18 = vld [vmem:[#allocation2 + $0xc] sm:$0x1]  ;;  %v36_v19 = vld [vmem:[#allocation2 + $0xd] sm:$0x1]  ;;  %v37_v20 = vld [vmem:[#allocation2 + $0xe] sm:$0x1]  ;;  %v44_v22 = vmax.f32 %v33_v13, %v34_v14  ;;  %v61_v24 = vmax.f32 %v32_v12, %v33_v13  ;;  %v48_v27 = vmax.f32 %v41_v11, %v42_v15  ;;  %v75_v36 = vmax.f32 %v40_v10, %v41_v11 }
  0x19   :  { %v38_v25 = vld [vmem:[#allocation2 + $0xf] sm:$0x1]  ;;  %v45_v26 = vmax.f32 %v35_v18, %v36_v19  ;;  %v62_v28 = vmax.f32 %v59_v16, %v60_v17  ;;  %v65_v29 = vmax.f32 %v34_v14, %v35_v18  ;;  %70 = vst [vmem:[#allocation5 + $0x6] sm:$0x1] %v47_v23  ;;  %v57_v32 = vmax.f32 %v47_v23, %v27_v4  ;;  %s164_s0 = smov [#allocation5]  }
  0x1a   :  { %v46_v30 = vmax.f32 %v37_v20, %v38_v25  ;;  %v49_v31 = vmax.f32 %v43_v21, %v44_v22  ;;  %v66_v33 = vmax.f32 %v36_v19, %v37_v20  ;;  %v51_v34 = vmax.f32 %v47_v23, %v48_v27  ;;  %71 = vst [vmem:[#allocation5 + $0x7] sm:$0x1] %v48_v27  ;;  %s97_s20 = sshll.u32 %s164_s0, 4  ;;  %s98_s20 = int_to_ptr.vmem [resolvable:$true] %s97_s20 }
  0x1b   :  { %v63_v35 = vmax.f32 %v62_v28, %v61_v24  ;;  %v77_v37 = vmax.f32 %v42_v15, %v43_v21  ;;  %58 = vst [vmem:[#allocation5 + $0x3] sm:$0x1] %v57_v32  ;;  %v79_v40 = vmax.f32 %v44_v22, %v45_v26  ;;  %v83_v41 = vmax.f32 %v40_v10, %v27_v4  ;;  %s135_s21 = scalar_lea.vmem %s98_s20, 384  ;;  %p140_p9 = scmp.lt.s32.totalorder %s98_s20, %s98_s20 }
  0x1c   :  { %v50_v38 = vmax.f32 %v45_v26, %v46_v30  ;;  %72 = vst [vmem:[#allocation5 + $0x8] sm:$0x1] %v49_v31  ;;  %81 = vst [vmem:[#allocation5 + $0xe] sm:$0x1] %v46_v30  ;;  %v67_v39 = vmax.f32 %v65_v29, %v66_v33  ;;  %v85_v42 = vmax.f32 %v59_v16, %v30_v8  ;;  %p136_p8 = scmp.ne.s32.totalorder %s98_s20, %s135_s21  ;;  %p141_p10 = scmp.lt.s32.totalorder %s135_s21, %s135_s21 }
  0x1d   :  { %91 = vst [vmem:[#allocation5 + $0x14] sm:$0x1] %v46_v30  ;;  %55 = vst [vmem:[#allocation5 + $0x1] sm:$0x1] %v51_v34  ;;  %v87_v43 = vmax.f32 %v43_v21, %v33_v13  ;;  %v89_v44 = vmax.f32 %v65_v29, %v36_v19 }
  0x1e   :  { %64 = vst [vmem:[#allocation5 + $0x4] sm:$0x1] %v63_v35  ;;  %76 = vst [vmem:[#allocation5 + $0xb] sm:$0x1] %v75_v36  ;;  %v52_v45 = vmax.f32 %v49_v31, %v50_v38  ;;  %v68_v46 = vmax.f32 %v67_v39, %v38_v25  ;;  %p142_p11 = por %p141_p10, %p140_p9 }
  0x1f   :  { %78 = vst [vmem:[#allocation5 + $0xc] sm:$0x1] %v77_v37  ;;  %73 = vst [vmem:[#allocation5 + $0x9] sm:$0x1] %v50_v38 }
  0x20   :  { %80 = vst [vmem:[#allocation5 + $0xd] sm:$0x1] %v79_v40  ;;  %84 = vst [vmem:[#allocation5 + $0x10] sm:$0x1] %v83_v41  ;;  %v53_v47 = vmax.f32 %v51_v34, %v52_v45  ;;  %p143_p12 = pnand %p142_p11, %p136_p8 }
  0x21   :  { %86 = vst [vmem:[#allocation5 + $0x11] sm:$0x1] %v85_v42  ;;  %88 = vst [vmem:[#allocation5 + $0x12] sm:$0x1] %v87_v43 }
  0x22   :  { %90 = vst [vmem:[#allocation5 + $0x13] sm:$0x1] %v89_v44  ;;  %56 = vst [vmem:[#allocation5 + $0x2] sm:$0x1] %v52_v45 }
  0x23   :  { %69 = vst [vmem:[#allocation5 + $0x5] sm:$0x1] %v68_v46  ;;  %54 = vst [vmem:[#allocation5] sm:$0x1] %v53_v47 }
  0x24   :  { %146 = shalt.err (!%p143_p12)
}
  0x25   :  { %s147_s24 = scalar_lea.hbm %s206_s1, 384 }
  0x26   :  { %p148_p13 = scmp.ne.s32.totalorder %s206_s1, %s147_s24  ;;  %p151_p0 = scmp.lt.u32.totalorder %s147_s24, %s206_s1 }
  0x28   :  { %p153_p1 = pnand %p151_p0, %p148_p13 }
  0x2a   :  { %156 = shalt.err (!%p153_p1)
}
  0x2b   :  { %103 = dma.vmem_to_hbm [thread:$0]  %s98_s20, 384, %s206_s1, [#allocation4], %s162_s16, %s162_s16, %s163_s17  }
  0x2c   :  { %159 = dma.done.wait [#allocation4], 384  }
  0x2d   :  { %160 = vsyncadd [#allocation4], 4294966912 }
  0x2e   :  { %107 = vsyncpa [#allocation3], 1 }
  0x2f   :  { %108 = vsyncpa [#allocation4], 1 }

</bundles_post_ra>
